<compile_context>
chip_gen: v7x
topology: tpu7x:2x2x1
jax: 0.10.0
libtpu: 0.0.40
codegen_flags: <defaults>
</compile_context>

<pallas_src>
import functools
import math

import jax
import jax.numpy as jnp
from jax.experimental import pallas as pl
from jax.experimental.pallas import tpu as pltpu


# ----------------------------------------------------------------------------
# Pallas kernel: linear1 + bias -> SiLU -> linear2 + bias, fully fused in VMEM.
# ----------------------------------------------------------------------------
def _mlp_kernel(emb_ref, w1_ref, b1_ref, w2_ref, b2_ref, o_ref):
    h = jnp.dot(emb_ref[...], w1_ref[...], preferred_element_type=jnp.float32)
    h = h + b1_ref[...]
    h = h * jax.nn.sigmoid(h)                                   # SiLU
    o_ref[...] = (
        jnp.dot(h, w2_ref[...], preferred_element_type=jnp.float32) + b2_ref[...]
    )


def gamma_embedding(params, gamma, *, dim, block_rows=256):
    """Pallas forward of GammaEmbedding: gamma (B,) -> (B, expansion*dim)."""
    B = gamma.shape[0]
    d_in, hidden = params["w1t"].shape

    # TODO(synk): the tiny (B, dim//2) sin/cos table is built in plain JAX here
    # (a few hundred bytes, launch-overhead free); everything downstream of it is
    # fused inside the Pallas kernel.
    x = gamma.reshape(B, 1).astype(jnp.float32) * params["freqs"][None, :]
    emb = jnp.concatenate([jnp.sin(x), jnp.cos(x)], axis=1)      # (B, 2*(dim//2))

    bm = min(block_rows, B)
    return pl.pallas_call(
        _mlp_kernel,
        out_shape=jax.ShapeDtypeStruct((B, hidden), jnp.float32),
        grid=(pl.cdiv(B, bm),),
        in_specs=[
            pl.BlockSpec((bm, d_in), lambda i: (i, 0)),          # activation rows
            pl.BlockSpec((d_in, hidden), lambda i: (0, 0)),      # W1^T (resident)
            pl.BlockSpec((1, hidden), lambda i: (0, 0)),         # b1 row
            pl.BlockSpec((hidden, hidden), lambda i: (0, 0)),    # W2^T (resident)
            pl.BlockSpec((1, hidden), lambda i: (0, 0)),         # b2 row
        ],
        out_specs=pl.BlockSpec((bm, hidden), lambda i: (i, 0)),
        compiler_params=pltpu.CompilerParams(
            dimension_semantics=("parallel",)
        ),
    )(emb, params["w1t"], params["b1_row"], params["w2t"], params["b2_row"])


# ----------------------------------------------------------------------------
# Parameters (deterministic, matching the PyTorch Linear init: xavier_uniform
# with gain sqrt(1.0) on the weight, zero bias).
# ----------------------------------------------------------------------------
def _xavier_uniform(key, out_f, in_f, gain=1.0):
    bound = gain * math.sqrt(6.0 / (in_f + out_f))
    return jax.random.uniform(
        key, (out_f, in_f), jnp.float32, minval=-bound, maxval=bound
    )


def build_params(key, dim, expansion):
    half = dim // 2
    d_in = 2 * half
    hidden = expansion * dim
    k1, k2 = jax.random.split(key)
    w1 = _xavier_uniform(k1, hidden, dim)       # torch layout (out, in)
    w2 = _xavier_uniform(k2, hidden, hidden)
    b1 = jnp.zeros((hidden,), jnp.float32)      # nn.init.constant_(bias, 0.0)
    b2 = jnp.zeros((hidden,), jnp.float32)
    scale = math.log(5000.0) / (half - 1)
    freqs = jnp.exp(jnp.arange(half, dtype=jnp.float32) * -scale)
    # Kernel layout: (in, out) weights and (1, N) bias rows, done once here.
    # When dim is odd, the PyTorch code right-pads emb with one zero column; that
    # column only ever multiplies the last row of W1^T, so dropping that row here
    # is mathematically identical.
    return dict(
        freqs=freqs,
        w1=w1, w2=w2, b1=b1, b2=b2,                         # reference layout
        w1t=jnp.transpose(w1)[:d_in, :],                    # (d_in, hidden)
        w2t=jnp.transpose(w2),                              # (hidden, hidden)
        b1_row=b1.reshape(1, hidden),
        b2_row=b2.reshape(1, hidden),
    )


# ----------------------------------------------------------------------------
# Pure-JAX reference (PyTorch semantics) for a tolerance check.
# ----------------------------------------------------------------------------
def gamma_embedding_ref(params, gamma, *, dim):
    hi = jax.lax.Precision.HIGHEST
    x = gamma.reshape(-1, 1).astype(jnp.float32) * params["freqs"][None, :]
    emb = jnp.concatenate([jnp.sin(x), jnp.cos(x)], axis=1)
    if dim % 2 != 0:
        emb = jnp.pad(emb, ((0, 0), (0, 1)))
    h = jnp.dot(emb, params["w1"].T, precision=hi) + params["b1"]
    h = h * jax.nn.sigmoid(h)
    return jnp.dot(h, params["w2"].T, precision=hi) + params["b2"]


# ----------------------------------------------------------------------------
# Main
# ----------------------------------------------------------------------------
if __name__ == "__main__":
    DIM, EXPANSION, BATCH = 32, 4, 2
    key = jax.random.PRNGKey(0)
    k_params, k_gamma = jax.random.split(key)
    params = build_params(k_params, DIM, EXPANSION)
    # gamma: per-example diffusion noise level / timestep scalar.
    gamma = jax.random.uniform(k_gamma, (BATCH,), jnp.float32, 0.0, 1000.0)

    fwd = jax.jit(functools.partial(gamma_embedding, dim=DIM))
    out = fwd(params, gamma)
    jax.block_until_ready(out)

    assert out.shape == (BATCH, EXPANSION * DIM), out.shape
    assert bool(jnp.all(jnp.isfinite(out)))
    ref = gamma_embedding_ref(params, gamma, dim=DIM)
    max_err = float(jnp.max(jnp.abs(out - ref)))
    assert bool(jnp.allclose(out, ref, rtol=2e-2, atol=2e-2)), max_err
    print("KERNEL_OK")
</pallas_src>

<mosaic_0001>
module attributes {stable_mosaic.version = 11 : i64} {
  func.func @_mlp_kernel(%arg0: i32, %arg1: memref<2x32xf32, #tpu.memory_space<vmem>>, %arg2: memref<32x128xf32, #tpu.memory_space<vmem>>, %arg3: memref<1x128xf32, #tpu.memory_space<vmem>>, %arg4: memref<128x128xf32, #tpu.memory_space<vmem>>, %arg5: memref<1x128xf32, #tpu.memory_space<vmem>>, %arg6: memref<2x128xf32, #tpu.memory_space<vmem>>) attributes {dimension_semantics = [#tpu.dimension_semantics<parallel>], iteration_bounds = array<i64: 1>, scalar_prefetch = 0 : i64, scratch_operands = 0 : i64, tpu.core_type = #tpu.core_type<tc>, window_params = [{transform_indices = @transform_0, window_bounds = array<i64: 2, 32>}, {pipeline_mode = #tpu.pipeline_mode<synchronous>, transform_indices = @transform_1, window_bounds = array<i64: 32, 128>}, {pipeline_mode = #tpu.pipeline_mode<synchronous>, transform_indices = @transform_2, window_bounds = array<i64: 1, 128>}, {pipeline_mode = #tpu.pipeline_mode<synchronous>, transform_indices = @transform_3, window_bounds = array<i64: 128, 128>}, {pipeline_mode = #tpu.pipeline_mode<synchronous>, transform_indices = @transform_4, window_bounds = array<i64: 1, 128>}, {transform_indices = @transform_5, window_bounds = array<i64: 2, 128>}]} {
    %c0 = arith.constant 0 : index
    %c0_0 = arith.constant 0 : index
    %0 = vector.load %arg1[%c0, %c0_0] : memref<2x32xf32, #tpu.memory_space<vmem>>, vector<2x32xf32>
    %c0_1 = arith.constant 0 : index
    %c0_2 = arith.constant 0 : index
    %1 = vector.load %arg2[%c0_1, %c0_2] : memref<32x128xf32, #tpu.memory_space<vmem>>, vector<32x128xf32>
    %cst = arith.constant dense<0.000000e+00> : vector<2x128xf32>
    %2 = tpu.matmul %0, %1, %cst {dimension_numbers = #tpu.dot_dimension_numbers<[1], [0], [0], [1], [0, 0, 1, 1], [], []>} : vector<2x32xf32>, vector<32x128xf32>, vector<2x128xf32> -> vector<2x128xf32>
    %c0_3 = arith.constant 0 : index
    %c0_4 = arith.constant 0 : index
    %3 = vector.load %arg3[%c0_3, %c0_4] : memref<1x128xf32, #tpu.memory_space<vmem>>, vector<1x128xf32>
    %4 = vector.broadcast %3 : vector<1x128xf32> to vector<2x128xf32>
    %5 = arith.addf %2, %4 : vector<2x128xf32>
    %6 = arith.negf %5 : vector<2x128xf32>
    %7 = math.exp %6 : vector<2x128xf32>
    %cst_5 = arith.constant 1.000000e+00 : f32
    %8 = vector.broadcast %cst_5 : f32 to vector<2x128xf32>
    %9 = arith.addf %8, %7 : vector<2x128xf32>
    %10 = arith.divf %8, %9 : vector<2x128xf32>
    %11 = arith.mulf %5, %10 : vector<2x128xf32>
    %c0_6 = arith.constant 0 : index
    %c0_7 = arith.constant 0 : index
    %12 = vector.load %arg4[%c0_6, %c0_7] : memref<128x128xf32, #tpu.memory_space<vmem>>, vector<128x128xf32>
    %cst_8 = arith.constant dense<0.000000e+00> : vector<2x128xf32>
    %13 = tpu.matmul %11, %12, %cst_8 {dimension_numbers = #tpu.dot_dimension_numbers<[1], [0], [0], [1], [0, 0, 1, 1], [], []>} : vector<2x128xf32>, vector<128x128xf32>, vector<2x128xf32> -> vector<2x128xf32>
    %c0_9 = arith.constant 0 : index
    %c0_10 = arith.constant 0 : index
    %14 = vector.load %arg5[%c0_9, %c0_10] : memref<1x128xf32, #tpu.memory_space<vmem>>, vector<1x128xf32>
    %15 = vector.broadcast %14 : vector<1x128xf32> to vector<2x128xf32>
    %16 = arith.addf %13, %15 : vector<2x128xf32>
    %c0_11 = arith.constant 0 : index
    %c0_12 = arith.constant 0 : index
    %17 = vector.load %arg6[%c0_11, %c0_12] : memref<2x128xf32, #tpu.memory_space<vmem>>, vector<2x128xf32>
    tpu.vector_store %arg6[%c0_11, %c0_12], %16 {strides = array<i32>} : memref<2x128xf32, #tpu.memory_space<vmem>>, vector<2x128xf32>,
    return
  }
  func.func @transform_0(%arg0: i32) -> (i32, i32) {
    %c0_i32 = arith.constant 0 : i32
    %c0_i32_0 = arith.constant 0 : i32
    return %arg0, %c0_i32 : i32, i32
  }
  func.func @transform_1(%arg0: i32) -> (i32, i32) {
    %c0_i32 = arith.constant 0 : i32
    %c0_i32_0 = arith.constant 0 : i32
    %c0_i32_1 = arith.constant 0 : i32
    return %c0_i32, %c0_i32_0 : i32, i32
  }
  func.func @transform_2(%arg0: i32) -> (i32, i32) {
    %c0_i32 = arith.constant 0 : i32
    %c0_i32_0 = arith.constant 0 : i32
    %c0_i32_1 = arith.constant 0 : i32
    return %c0_i32, %c0_i32_0 : i32, i32
  }
  func.func @transform_3(%arg0: i32) -> (i32, i32) {
    %c0_i32 = arith.constant 0 : i32
    %c0_i32_0 = arith.constant 0 : i32
    %c0_i32_1 = arith.constant 0 : i32
    return %c0_i32, %c0_i32_0 : i32, i32
  }
  func.func @transform_4(%arg0: i32) -> (i32, i32) {
    %c0_i32 = arith.constant 0 : i32
    %c0_i32_0 = arith.constant 0 : i32
    %c0_i32_1 = arith.constant 0 : i32
    return %c0_i32, %c0_i32_0 : i32, i32
  }
  func.func @transform_5(%arg0: i32) -> (i32, i32) {
    %c0_i32 = arith.constant 0 : i32
    %c0_i32_0 = arith.constant 0 : i32
    return %arg0, %c0_i32 : i32, i32
  }
}

</mosaic_0001>

<bundles_post_ra>
// kernel: gamma_embedding.1
= control target key start
LH: loop header
LB: loop body
LE: loop exit
PB: predicated region body
PF: predicated region fallthrough
CT: control target
= control target key end

     0   :  { %10 = vsyncpa [#allocation3], 0  ;;  %s521_s0 = inlined_call_operand.vmem [shape: f32[2,32], index: 0, kind: input, shape index: {}]   ;;  %s522_s1 = inlined_call_operand.hbm [shape: f32[32,128], index: 1, kind: input, shape index: {}]   ;;  %s523_s2 = inlined_call_operand.vmem [shape: f32[1,128], index: 2, kind: input, shape index: {}]   ;;  %s524_s3 = inlined_call_operand.hbm [shape: f32[128,128], index: 3, kind: input, shape index: {}]   ;;  %s525_s4 = inlined_call_operand.vmem [shape: f32[1,128], index: 4, kind: input, shape index: {}]   ;;  %s526_s5 = inlined_call_operand.hbm [shape: f32[2,128], index: 5, kind: output, shape index: {}]  }
   0x1   :  { %11 = vsyncpa [#allocation6], 0 }
   0x2   :  { %12 = vsyncpa [#allocation4], 0  ;;  %s438_s18 = smov [#allocation2]   ;;  %s366_s22 = scalar_lea.hbm %s522_s1, 512 }
   0x3   :  { %s20_s19 = sshll.u32 %s438_s18, 4  ;;  %p367_p0 = scmp.ne.s32.totalorder %s522_s1, %s366_s22  ;;  %s21_s19 = int_to_ptr.vmem [resolvable:$true] %s20_s19 }
   0x4   :  { %p370_p1 = scmp.lt.u32.totalorder %s366_s22, %s522_s1 }
   0x6   :  { %p372_p2 = pnand %p370_p1, %p367_p0 }
   0x8   :  { %375 = shalt.err (!%p372_p2)
}
   0x9   :  { %s376_s27 = scalar_lea.vmem %s21_s19, 512  ;;  %p381_p4 = scmp.lt.s32.totalorder %s21_s19, %s21_s19 }
   0xa   :  { %p377_p3 = scmp.ne.s32.totalorder %s21_s19, %s376_s27  ;;  %p382_p5 = scmp.lt.s32.totalorder %s376_s27, %s376_s27 }
   0xc   :  { %p383_p6 = por %p382_p5, %p381_p4 }
   0xe   :  { %p384_p7 = pnand %p383_p6, %p377_p3 }
  0x10   :  { %387 = shalt.err (!%p384_p7)
}
  0x11   :  { %s439_s28 = smov 128   ;;  %s440_s29 = smov 8  }
  0x12   :  { %26 = dma.hbm_to_vmem [thread:$0]  %s522_s1, 512, %s21_s19, [#allocation3], %s439_s28, %s439_s28, %s440_s29  }
  0x13   :  { %s441_s7 = smov [#allocation5]   ;;  %s388_s11 = scalar_lea.hbm %s524_s3, 2048 }
  0x14   :  { %s34_s8 = sshll.u32 %s441_s7, 4  ;;  %p389_p8 = scmp.ne.s32.totalorder %s524_s3, %s388_s11  ;;  %s35_s8 = int_to_ptr.vmem [resolvable:$true] %s34_s8 }
  0x15   :  { %p392_p9 = scmp.lt.u32.totalorder %s388_s11, %s524_s3 }
  0x17   :  { %p394_p10 = pnand %p392_p9, %p389_p8 }
  0x19   :  { %397 = shalt.err (!%p394_p10)
}
  0x1a   :  { %s398_s16 = scalar_lea.vmem %s35_s8, 2048  ;;  %p403_p12 = scmp.lt.s32.totalorder %s35_s8, %s35_s8 }
  0x1b   :  { %p399_p11 = scmp.ne.s32.totalorder %s35_s8, %s398_s16  ;;  %p404_p13 = scmp.lt.s32.totalorder %s398_s16, %s398_s16 }
  0x1d   :  { %p405_p0 = por %p404_p13, %p403_p12 }
  0x1f   :  { %p406_p1 = pnand %p405_p0, %p399_p11 }
  0x21   :  { %409 = shalt.err (!%p406_p1)
}
  0x22   :  { %40 = dma.hbm_to_vmem [thread:$0]  %s524_s3, 2048, %s35_s8, [#allocation6], %s439_s28, %s439_s28, %s440_s29  }
  0x23   :  { %432 = dma.done.wait [#allocation3], 512  }
  0x24   :  { %433 = vsyncadd [#allocation3], 4294966784 }
  0x25   :  { %434 = dma.done.wait [#allocation6], 2048  }
  0x26   :  { %435 = vsyncadd [#allocation6], 4294965248  ;;  %v442_v0 = vmov 0.0|0.0   ;;  %vm443_vm0 = vmmov 0   ;;  %v444_v1 = vmov 0.0   ;;  %v50_v2 = vld [vmem:[#allocation2] sm:$0xff] }
  0x27   :  { %324 = vmatprep.subr.bf16.mxu0 %v442_v0  ;;  %286 = vmatprep.mubr.msk.f32.mxu0 %vm443_vm0, %v444_v1  ;;  %v51_v3 = vld [vmem:[#allocation2 + $0x8] sm:$0xff]  ;;  %v52_v4 = vld [vmem:[#allocation2 + $0x10] sm:$0xff]  ;;  %v53_v6 = vld [vmem:[#allocation2 + $0x18] sm:$0xff]  ;;  %vm61_vm1 = vcmask 261120   ;;  %s445_s22 = smov [#allocation7]  }
  0x28   :  { %330 = vmatprep.subr.bf16.mxu1 %v442_v0  ;;  %321 = vmatprep.mubr.msk.f32.mxu1 %vm443_vm0, %v444_v1  ;;  %v325_v5 = vpack.c.bf16 %v51_v3, %v50_v2  ;;  %v328_v7 = vpack.c.bf16 %v53_v6, %v52_v4  ;;  %v49_v8 = vld [vmem:[%s521_s0] sm:$0x3]  ;;  %v143_v10 = vld [vmem:[#allocation5 + $0x8] sm:$0xff]  ;;  %v144_v12 = vld [vmem:[#allocation5 + $0x10] sm:$0xff]  ;;  %s242_s23 = sshll.u32 %s445_s22, 4  ;;  %s243_s23 = int_to_ptr.vmem [resolvable:$true] %s242_s23 }
  0x29   :  { %v142_v9 = vld [vmem:[#allocation5] sm:$0xff]  ;;  %v145_v13 = vld [vmem:[#allocation5 + $0x18] sm:$0xff]  ;;  %v147_v16 = vld [vmem:[#allocation5 + $0x28] sm:$0xff]  ;;  %p415_p3 = scmp.lt.s32.totalorder %s243_s23, %s243_s23 }
  0x2a   :  { %326 = vmatpush3.bf16.msra.mxu0 %v325_v5  ;;  %v331_v11 = vpack.c.bf16 %v143_v10, %v142_v9  ;;  %v334_v14 = vpack.c.bf16 %v145_v13, %v144_v12  ;;  %v146_v15 = vld [vmem:[#allocation5 + $0x20] sm:$0xff]  ;;  %v148_v18 = vld [vmem:[#allocation5 + $0x30] sm:$0xff]  ;;  %v149_v19 = vld [vmem:[#allocation5 + $0x38] sm:$0xff] }
  0x2b   :  { %327 = vmatprep.subr.bf16.mxu0 %v442_v0  ;;  %v337_v17 = vpack.c.bf16 %v147_v16, %v146_v15  ;;  %v340_v20 = vpack.c.bf16 %v149_v19, %v148_v18  ;;  %v150_v21 = vld [vmem:[#allocation5 + $0x40] sm:$0xff]  ;;  %v151_v22 = vld [vmem:[#allocation5 + $0x48] sm:$0xff]  ;;  %v152_v24 = vld [vmem:[#allocation5 + $0x50] sm:$0xff] }
  0x2c   :  { %332 = vmatpush3.bf16.msra.mxu1 %v331_v11  ;;  %v343_v23 = vpack.c.bf16 %v151_v22, %v150_v21  ;;  %v153_v25 = vld [vmem:[#allocation5 + $0x58] sm:$0xff]  ;;  %v154_v27 = vld [vmem:[#allocation5 + $0x60] sm:$0xff]  ;;  %v155_v28 = vld [vmem:[#allocation5 + $0x68] sm:$0xff] }
  0x2d   :  { %333 = vmatprep.subr.bf16.mxu1 %v442_v0  ;;  %v346_v26 = vpack.c.bf16 %v153_v25, %v152_v24  ;;  %v349_v29 = vpack.c.bf16 %v155_v28, %v154_v27  ;;  %v156_v30 = vld [vmem:[#allocation5 + $0x70] sm:$0xff]  ;;  %v157_v31 = vld [vmem:[#allocation5 + $0x78] sm:$0xff]  ;;  %v252_v33 = vld [vmem:[%s523_s2] ss:$0 sm:$0xff]  ;;  %s410_s2 = scalar_lea.vmem %s243_s23, 32 }
  0x2e   :  { %329 = vmatpush3.bf16.msra.mxu0 %v328_v7  ;;  %v352_v32 = vpack.c.bf16 %v157_v31, %v156_v30  ;;  %v255_v42 = vld [vmem:[%s525_s4] ss:$0 sm:$0xff]  ;;  %p411_p2 = scmp.ne.s32.totalorder %s243_s23, %s410_s2  ;;  %p416_p4 = scmp.lt.s32.totalorder %s410_s2, %s410_s2 }
  0x30   :  { %335 = vmatpush3.bf16.msra.mxu1 %v334_v14  ;;  %p417_p5 = por %p416_p4, %p415_p3 }
  0x31   :  { %287 = vmatmul.mubr.msk.f32.vlgmr.msra.gmra.mrb[0].mxu0 %vm61_vm1, %v49_v8  ;;  %336 = vmatprep.subr.bf16.mxu1 %v442_v0 }
  0x32   :  { %p418_p6 = pnand %p417_p5, %p411_p2 }
  0x34   :  { %338 = vmatpush3.bf16.msra.mxu1 %v337_v17 }
  0x35   :  { %339 = vmatprep.subr.bf16.mxu1 %v442_v0 }
  0x38   :  { %341 = vmatpush3.bf16.msra.mxu1 %v340_v20 }
  0x39   :  { %342 = vmatprep.subr.bf16.mxu1 %v442_v0 }
  0x3c   :  { %344 = vmatpush3.bf16.msra.mxu1 %v343_v23 }
  0x3d   :  { %345 = vmatprep.subr.bf16.mxu1 %v442_v0 }
  0x40   :  { %347 = vmatpush3.bf16.msra.mxu1 %v346_v26 }
  0x41   :  { %348 = vmatprep.subr.bf16.mxu1 %v442_v0 }
  0x44   :  { %350 = vmatpush3.bf16.msra.mxu1 %v349_v29 }
  0x45   :  { %351 = vmatprep.subr.bf16.mxu1 %v442_v0 }
  0x48   :  { %353 = vmatpush3.bf16.msra.mxu1 %v352_v32 }
 0x104   :  { %v131_v34 = vpop.f32.mrb[0].mxu0 }
 0x105   :  { %v132_v35 = vadd.f32 %v252_v33, %v131_v34  ;;  %v288_v36 = vpop.f32.mrb[1].mxu0 }
 0x107   :  { %v254_v37 = vmul.f32 -1.442695, %v132_v35 }
 0x109   :  { %362 = vpow2.f32 %v254_v37 }
 0x113   :  { %v363_v38 = vpop.eup %362 }
 0x114   :  { %v138_v39 = vadd.f32 1.0, %v363_v38 }
 0x116   :  { %364 = vrcp.f32 %v138_v39 }
 0x120   :  { %v365_v40 = vpop.eup %364 }
 0x121   :  { %v141_v41 = vmul.f32 %v365_v40, %v132_v35 }
 0x123   :  { %322 = vmatmul.mubr.f32.vlgmr.msra.gmra.mrb[0].mxu1 %v141_v41 }
 0x1f6   :  { %v231_v43 = vpop.f32.mrb[0].mxu1 }
 0x1f7   :  { %v232_v44 = vadd.f32 %v255_v42, %v231_v43  ;;  %v323_v45 = vpop.f32.mrb[1].mxu1 }
 0x1f9   :  { %235 = vst [vmem:[#allocation7] sm:$0x3] %v232_v44 }
 0x1fa   :  { %421 = shalt.err (!%p418_p6)
}
 0x1fb   :  { %s422_s26 = scalar_lea.hbm %s526_s5, 32 }
 0x1fc   :  { %p423_p7 = scmp.ne.s32.totalorder %s526_s5, %s422_s26  ;;  %p426_p8 = scmp.lt.u32.totalorder %s422_s26, %s526_s5 }
 0x1fe   :  { %p428_p9 = pnand %p426_p8, %p423_p7 }
 0x200   :  { %431 = shalt.err (!%p428_p9)
}
 0x201   :  { %245 = dma.vmem_to_hbm [thread:$0]  %s243_s23, 32, %s526_s5, [#allocation4]  }
 0x202   :  { %436 = dma.done.wait [#allocation4], 32  }
 0x203   :  { %437 = vsyncadd [#allocation4], 4294967264 }
 0x204   :  { %249 = vsyncpa [#allocation3], 1 }
 0x205   :  { %250 = vsyncpa [#allocation6], 1 }
 0x206   :  { %251 = vsyncpa [#allocation4], 1 }

</bundles_post_ra>
